<compile_context>
chip_gen: v7x
topology: tpu7x:2x2x1
jax: 0.10.0
libtpu: 0.0.40
codegen_flags: <defaults>
</compile_context>

<pallas_src>
import functools
import math

import jax
import jax.numpy as jnp
from jax.experimental import pallas as pl
from jax.experimental.pallas import tpu as pltpu

HIDDEN = 32
N_SPLITS = 4
BATCH = 2
SEQ = 8


# ------------------------------- Pallas kernel ------------------------------
def _multi_head_kernel(q_ref, k_ref, v_ref, wq_ref, wk_ref, wv_ref, wo_ref,
                       *rest, n_splits, scale, has_mask):
    """Fused multi-head attention for one batch element.

    q_ref/k_ref/v_ref : (1, T, H)   activations
    wq/wk/wv_ref      : (H, H)      W^T of the projection Linears (no bias)
    wo_ref            : (H, H)      W^T of the output Linear (no bias)
    optional m_ref    : (1, T, T)   additive mask bias (0 or -1e30)
    o_ref             : (1, T, H)
    """
    if has_mask:
        m_ref, o_ref = rest
    else:
        (o_ref,) = rest

    q = q_ref[0]                      # (T, H)
    k = k_ref[0]
    v = v_ref[0]
    T, H = q.shape
    dh = H // n_splits

    out = jnp.zeros((T, H), jnp.float32)
    for h in range(n_splits):         # static unroll over heads
        lo = h * dh
        # Per-head projections: slice the (transposed) weight columns.
        qh = jnp.dot(q, wq_ref[:, lo:lo + dh], preferred_element_type=jnp.float32)
        kh = jnp.dot(k, wk_ref[:, lo:lo + dh], preferred_element_type=jnp.float32)
        vh = jnp.dot(v, wv_ref[:, lo:lo + dh], preferred_element_type=jnp.float32)

        # scores = Q K^T / sqrt(dh)  (contraction expressed directly, no .T)
        s = jax.lax.dot_general(qh, kh, (((1,), (1,)), ((), ())),
                                preferred_element_type=jnp.float32) * scale
        if has_mask:
            s = s + m_ref[0]

        # numerically-stable softmax over keys
        s = s - jnp.max(s, axis=-1, keepdims=True)
        e = jnp.exp(s)
        p = e / jnp.sum(e, axis=-1, keepdims=True)

        ctx_h = jnp.dot(p, vh, preferred_element_type=jnp.float32)     # (T, dh)
        # Head re-merge + output Linear fused: ctx @ Wo^T == sum_h ctx_h @ Wo^T[rows of head h]
        out = out + jnp.dot(ctx_h, wo_ref[lo:lo + dh, :],
                            preferred_element_type=jnp.float32)

    o_ref[0] = out


# --------------------------------- wrapper ----------------------------------
def multi_head(params, Q, K, V, mask=None, n_splits=N_SPLITS):
    Bsz, T, H = Q.shape
    assert H % n_splits == 0
    dh = H // n_splits
    scale = 1.0 / math.sqrt(dh)
    f32 = jnp.float32

    # nn.Linear computes x @ W^T; pre-transpose once on the host.
    wq_t = params["wq"].T.astype(f32)
    wk_t = params["wk"].T.astype(f32)
    wv_t = params["wv"].T.astype(f32)
    wo_t = params["wo"].T.astype(f32)

    seq_spec = pl.BlockSpec((1, T, H), lambda b: (b, 0, 0))
    w_spec = pl.BlockSpec((H, H), lambda b: (0, 0))

    inputs = [Q.astype(f32), K.astype(f32), V.astype(f32), wq_t, wk_t, wv_t, wo_t]
    in_specs = [seq_spec, seq_spec, seq_spec, w_spec, w_spec, w_spec, w_spec]

    has_mask = mask is not None
    if has_mask:
        # boolean mask (B, T, T): True means "mask out" -> additive -1e30 bias
        neg = jnp.where(mask, jnp.float32(-1e30), jnp.float32(0.0))
        inputs.append(neg)
        in_specs.append(pl.BlockSpec((1, T, T), lambda b: (b, 0, 0)))

    kernel = functools.partial(_multi_head_kernel, n_splits=n_splits,
                               scale=scale, has_mask=has_mask)
    return pl.pallas_call(
        kernel,
        out_shape=jax.ShapeDtypeStruct((Bsz, T, H), f32),
        grid=(Bsz,),
        in_specs=in_specs,
        out_specs=pl.BlockSpec((1, T, H), lambda b: (b, 0, 0)),
        compiler_params=pltpu.CompilerParams(
            dimension_semantics=("parallel",)),
    )(*inputs)


# ----------------------------- pure-JAX reference ---------------------------
def multi_head_reference(params, Q, K, V, mask=None, n_splits=N_SPLITS):
    """Literal translation of the PyTorch MultiHead.forward (for validation)."""
    H = Q.shape[-1]
    dh = H // n_splits
    hp = jax.lax.Precision.HIGHEST
    qw = jnp.einsum("bth,oh->bto", Q, params["wq"], precision=hp)
    kw = jnp.einsum("bth,oh->bto", K, params["wk"], precision=hp)
    vw = jnp.einsum("bth,oh->bto", V, params["wv"], precision=hp)
    split_cat = lambda x: jnp.concatenate(jnp.split(x, n_splits, axis=-1), axis=0)
    qs, ks, vs = split_cat(qw), split_cat(kw), split_cat(vw)
    w = jnp.einsum("btd,bsd->bts", qs, ks, precision=hp)
    if mask is not None:
        mm = jnp.concatenate([mask] * n_splits, axis=0)
        w = jnp.where(mm, -jnp.inf, w)
    w = jax.nn.softmax(w / math.sqrt(dh), axis=-1)
    c = jnp.einsum("bts,bsd->btd", w, vs, precision=hp)
    c = jnp.concatenate(jnp.split(c, n_splits, axis=0), axis=-1)
    return jnp.einsum("bth,oh->bto", c, params["wo"], precision=hp)


# ------------------------------- parameter init ------------------------------
def init_params(key, hidden):
    bound = 1.0 / math.sqrt(hidden)          # nn.Linear default init range
    names = ["wq", "wk", "wv", "wo"]
    keys = jax.random.split(key, len(names))
    return {n: jax.random.uniform(k, (hidden, hidden), jnp.float32, -bound, bound)
            for n, k in zip(names, keys)}


# ----------------------------------- main ------------------------------------
if __name__ == "__main__":
    key = jax.random.PRNGKey(0)
    kp, kq, kk, kv = jax.random.split(key, 4)
    params = init_params(kp, HIDDEN)
    Q = jax.random.normal(kq, (BATCH, SEQ, HIDDEN), jnp.float32)
    K = jax.random.normal(kk, (BATCH, SEQ, HIDDEN), jnp.float32)
    V = jax.random.normal(kv, (BATCH, SEQ, HIDDEN), jnp.float32)

    out = multi_head(params, Q, K, V, mask=None, n_splits=N_SPLITS)
    out = jax.block_until_ready(out)
    assert out.shape == (BATCH, SEQ, HIDDEN) and out.dtype == jnp.float32

    ref = jax.block_until_ready(
        multi_head_reference(params, Q, K, V, mask=None, n_splits=N_SPLITS))
    max_err = float(jnp.max(jnp.abs(out - ref)))
    assert max_err < 5e-2, f"kernel/reference mismatch: max abs err = {max_err}"

    print("KERNEL_OK")
</pallas_src>

<mosaic_0001>
module attributes {stable_mosaic.version = 11 : i64} {
  func.func @_multi_head_kernel(%arg0: i32, %arg1: memref<1x8x32xf32, #tpu.memory_space<vmem>>, %arg2: memref<1x8x32xf32, #tpu.memory_space<vmem>>, %arg3: memref<1x8x32xf32, #tpu.memory_space<vmem>>, %arg4: memref<32x32xf32, #tpu.memory_space<vmem>>, %arg5: memref<32x32xf32, #tpu.memory_space<vmem>>, %arg6: memref<32x32xf32, #tpu.memory_space<vmem>>, %arg7: memref<32x32xf32, #tpu.memory_space<vmem>>, %arg8: memref<1x8x32xf32, #tpu.memory_space<vmem>>) attributes {dimension_semantics = [#tpu.dimension_semantics<parallel>], iteration_bounds = array<i64: 2>, scalar_prefetch = 0 : i64, scratch_operands = 0 : i64, tpu.core_type = #tpu.core_type<tc>, window_params = [{transform_indices = @transform_0, window_bounds = array<i64: 1, 8, 32>}, {transform_indices = @transform_1, window_bounds = array<i64: 1, 8, 32>}, {transform_indices = @transform_2, window_bounds = array<i64: 1, 8, 32>}, {pipeline_mode = #tpu.pipeline_mode<synchronous>, transform_indices = @transform_3, window_bounds = array<i64: 32, 32>}, {pipeline_mode = #tpu.pipeline_mode<synchronous>, transform_indices = @transform_4, window_bounds = array<i64: 32, 32>}, {pipeline_mode = #tpu.pipeline_mode<synchronous>, transform_indices = @transform_5, window_bounds = array<i64: 32, 32>}, {pipeline_mode = #tpu.pipeline_mode<synchronous>, transform_indices = @transform_6, window_bounds = array<i64: 32, 32>}, {transform_indices = @transform_7, window_bounds = array<i64: 1, 8, 32>}]} {
    %c0 = arith.constant 0 : index
    %c0_0 = arith.constant 0 : index
    %c0_1 = arith.constant 0 : index
    %0 = vector.load %arg1[%c0, %c0_0, %c0_1] : memref<1x8x32xf32, #tpu.memory_space<vmem>>, vector<1x8x32xf32>
    %1 = vector.shape_cast %0 : vector<1x8x32xf32> to vector<8x32xf32>
    %c0_2 = arith.constant 0 : index
    %c0_3 = arith.constant 0 : index
    %c0_4 = arith.constant 0 : index
    %2 = vector.load %arg2[%c0_2, %c0_3, %c0_4] : memref<1x8x32xf32, #tpu.memory_space<vmem>>, vector<1x8x32xf32>
    %3 = vector.shape_cast %2 : vector<1x8x32xf32> to vector<8x32xf32>
    %c0_5 = arith.constant 0 : index
    %c0_6 = arith.constant 0 : index
    %c0_7 = arith.constant 0 : index
    %4 = vector.load %arg3[%c0_5, %c0_6, %c0_7] : memref<1x8x32xf32, #tpu.memory_space<vmem>>, vector<1x8x32xf32>
    %5 = vector.shape_cast %4 : vector<1x8x32xf32> to vector<8x32xf32>
    %cst = arith.constant 0.000000e+00 : f32
    %6 = vector.broadcast %cst : f32 to vector<8x32xf32>
    %c0_8 = arith.constant 0 : index
    %c0_9 = arith.constant 0 : index
    %7 = vector.load %arg4[%c0_8, %c0_9] : memref<32x32xf32, #tpu.memory_space<vmem>>, vector<32x8xf32>
    %cst_10 = arith.constant dense<0.000000e+00> : vector<8x8xf32>
    %8 = tpu.matmul %1, %7, %cst_10 {dimension_numbers = #tpu.dot_dimension_numbers<[1], [0], [0], [1], [0, 0, 1, 1], [], []>} : vector<8x32xf32>, vector<32x8xf32>, vector<8x8xf32> -> vector<8x8xf32>
    %c0_11 = arith.constant 0 : index
    %c0_12 = arith.constant 0 : index
    %9 = vector.load %arg5[%c0_11, %c0_12] : memref<32x32xf32, #tpu.memory_space<vmem>>, vector<32x8xf32>
    %cst_13 = arith.constant dense<0.000000e+00> : vector<8x8xf32>
    %10 = tpu.matmul %3, %9, %cst_13 {dimension_numbers = #tpu.dot_dimension_numbers<[1], [0], [0], [1], [0, 0, 1, 1], [], []>} : vector<8x32xf32>, vector<32x8xf32>, vector<8x8xf32> -> vector<8x8xf32>
    %c0_14 = arith.constant 0 : index
    %c0_15 = arith.constant 0 : index
    %11 = vector.load %arg6[%c0_14, %c0_15] : memref<32x32xf32, #tpu.memory_space<vmem>>, vector<32x8xf32>
    %cst_16 = arith.constant dense<0.000000e+00> : vector<8x8xf32>
    %12 = tpu.matmul %5, %11, %cst_16 {dimension_numbers = #tpu.dot_dimension_numbers<[1], [0], [0], [1], [0, 0, 1, 1], [], []>} : vector<8x32xf32>, vector<32x8xf32>, vector<8x8xf32> -> vector<8x8xf32>
    %cst_17 = arith.constant dense<0.000000e+00> : vector<8x8xf32>
    %13 = tpu.matmul %8, %10, %cst_17 {dimension_numbers = #tpu.dot_dimension_numbers<[1], [1], [0], [0], [0, 0, 1, 0], [], []>} : vector<8x8xf32>, vector<8x8xf32>, vector<8x8xf32> -> vector<8x8xf32>
    %cst_18 = arith.constant 0.353553385 : f32
    %14 = vector.broadcast %cst_18 : f32 to vector<8x8xf32>
    %15 = arith.mulf %13, %14 : vector<8x8xf32>
    %cst_19 = arith.constant dense<0xFF800000> : vector<8xf32>
    %16 = vector.multi_reduction <maximumf>, %15, %cst_19 [1] : vector<8x8xf32> to vector<8xf32>
    %17 = vector.shape_cast %16 : vector<8xf32> to vector<8x1xf32>
    %18 = vector.broadcast %17 : vector<8x1xf32> to vector<8x8xf32>
    %19 = arith.subf %15, %18 : vector<8x8xf32>
    %20 = math.exp %19 : vector<8x8xf32>
    %cst_20 = arith.constant dense<0.000000e+00> : vector<8xf32>
    %21 = vector.multi_reduction <add>, %20, %cst_20 [1] : vector<8x8xf32> to vector<8xf32>
    %22 = vector.shape_cast %21 : vector<8xf32> to vector<8x1xf32>
    %23 = vector.broadcast %22 : vector<8x1xf32> to vector<8x8xf32>
    %24 = arith.divf %20, %23 : vector<8x8xf32>
    %cst_21 = arith.constant dense<0.000000e+00> : vector<8x8xf32>
    %25 = tpu.matmul %24, %12, %cst_21 {dimension_numbers = #tpu.dot_dimension_numbers<[1], [0], [0], [1], [0, 0, 1, 1], [], []>} : vector<8x8xf32>, vector<8x8xf32>, vector<8x8xf32> -> vector<8x8xf32>
    %c0_22 = arith.constant 0 : index
    %c0_23 = arith.constant 0 : index
    %26 = vector.load %arg7[%c0_22, %c0_23] : memref<32x32xf32, #tpu.memory_space<vmem>>, vector<8x32xf32>
    %cst_24 = arith.constant dense<0.000000e+00> : vector<8x32xf32>
    %27 = tpu.matmul %25, %26, %cst_24 {dimension_numbers = #tpu.dot_dimension_numbers<[1], [0], [0], [1], [0, 0, 1, 1], [], []>} : vector<8x8xf32>, vector<8x32xf32>, vector<8x32xf32> -> vector<8x32xf32>
    %28 = arith.addf %6, %27 : vector<8x32xf32>
    %c0_25 = arith.constant 0 : index
    %c8 = arith.constant 8 : index
    %29 = vector.load %arg4[%c0_25, %c8] : memref<32x32xf32, #tpu.memory_space<vmem>>, vector<32x8xf32>
    %cst_26 = arith.constant dense<0.000000e+00> : vector<8x8xf32>
    %30 = tpu.matmul %1, %29, %cst_26 {dimension_numbers = #tpu.dot_dimension_numbers<[1], [0], [0], [1], [0, 0, 1, 1], [], []>} : vector<8x32xf32>, vector<32x8xf32>, vector<8x8xf32> -> vector<8x8xf32>
    %c0_27 = arith.constant 0 : index
    %c8_28 = arith.constant 8 : index
    %31 = vector.load %arg5[%c0_27, %c8_28] : memref<32x32xf32, #tpu.memory_space<vmem>>, vector<32x8xf32>
    %cst_29 = arith.constant dense<0.000000e+00> : vector<8x8xf32>
    %32 = tpu.matmul %3, %31, %cst_29 {dimension_numbers = #tpu.dot_dimension_numbers<[1], [0], [0], [1], [0, 0, 1, 1], [], []>} : vector<8x32xf32>, vector<32x8xf32>, vector<8x8xf32> -> vector<8x8xf32>
    %c0_30 = arith.constant 0 : index
    %c8_31 = arith.constant 8 : index
    %33 = vector.load %arg6[%c0_30, %c8_31] : memref<32x32xf32, #tpu.memory_space<vmem>>, vector<32x8xf32>
    %cst_32 = arith.constant dense<0.000000e+00> : vector<8x8xf32>
    %34 = tpu.matmul %5, %33, %cst_32 {dimension_numbers = #tpu.dot_dimension_numbers<[1], [0], [0], [1], [0, 0, 1, 1], [], []>} : vector<8x32xf32>, vector<32x8xf32>, vector<8x8xf32> -> vector<8x8xf32>
    %cst_33 = arith.constant dense<0.000000e+00> : vector<8x8xf32>
    %35 = tpu.matmul %30, %32, %cst_33 {dimension_numbers = #tpu.dot_dimension_numbers<[1], [1], [0], [0], [0, 0, 1, 0], [], []>} : vector<8x8xf32>, vector<8x8xf32>, vector<8x8xf32> -> vector<8x8xf32>
    %cst_34 = arith.constant 0.353553385 : f32
    %36 = vector.broadcast %cst_34 : f32 to vector<8x8xf32>
    %37 = arith.mulf %35, %36 : vector<8x8xf32>
    %cst_35 = arith.constant dense<0xFF800000> : vector<8xf32>
    %38 = vector.multi_reduction <maximumf>, %37, %cst_35 [1] : vector<8x8xf32> to vector<8xf32>
    %39 = vector.shape_cast %38 : vector<8xf32> to vector<8x1xf32>
    %40 = vector.broadcast %39 : vector<8x1xf32> to vector<8x8xf32>
    %41 = arith.subf %37, %40 : vector<8x8xf32>
    %42 = math.exp %41 : vector<8x8xf32>
    %cst_36 = arith.constant dense<0.000000e+00> : vector<8xf32>
    %43 = vector.multi_reduction <add>, %42, %cst_36 [1] : vector<8x8xf32> to vector<8xf32>
    %44 = vector.shape_cast %43 : vector<8xf32> to vector<8x1xf32>
    %45 = vector.broadcast %44 : vector<8x1xf32> to vector<8x8xf32>
    %46 = arith.divf %42, %45 : vector<8x8xf32>
    %cst_37 = arith.constant dense<0.000000e+00> : vector<8x8xf32>
    %47 = tpu.matmul %46, %34, %cst_37 {dimension_numbers = #tpu.dot_dimension_numbers<[1], [0], [0], [1], [0, 0, 1, 1], [], []>} : vector<8x8xf32>, vector<8x8xf32>, vector<8x8xf32> -> vector<8x8xf32>
    %c8_38 = arith.constant 8 : index
    %c0_39 = arith.constant 0 : index
    %48 = vector.load %arg7[%c8_38, %c0_39] : memref<32x32xf32, #tpu.memory_space<vmem>>, vector<8x32xf32>
    %cst_40 = arith.constant dense<0.000000e+00> : vector<8x32xf32>
    %49 = tpu.matmul %47, %48, %cst_40 {dimension_numbers = #tpu.dot_dimension_numbers<[1], [0], [0], [1], [0, 0, 1, 1], [], []>} : vector<8x8xf32>, vector<8x32xf32>, vector<8x32xf32> -> vector<8x32xf32>
    %50 = arith.addf %28, %49 : vector<8x32xf32>
    %c0_41 = arith.constant 0 : index
    %c16 = arith.constant 16 : index
    %51 = vector.load %arg4[%c0_41, %c16] : memref<32x32xf32, #tpu.memory_space<vmem>>, vector<32x8xf32>
    %cst_42 = arith.constant dense<0.000000e+00> : vector<8x8xf32>
    %52 = tpu.matmul %1, %51, %cst_42 {dimension_numbers = #tpu.dot_dimension_numbers<[1], [0], [0], [1], [0, 0, 1, 1], [], []>} : vector<8x32xf32>, vector<32x8xf32>, vector<8x8xf32> -> vector<8x8xf32>
    %c0_43 = arith.constant 0 : index
    %c16_44 = arith.constant 16 : index
    %53 = vector.load %arg5[%c0_43, %c16_44] : memref<32x32xf32, #tpu.memory_space<vmem>>, vector<32x8xf32>
    %cst_45 = arith.constant dense<0.000000e+00> : vector<8x8xf32>
    %54 = tpu.matmul %3, %53, %cst_45 {dimension_numbers = #tpu.dot_dimension_numbers<[1], [0], [0], [1], [0, 0, 1, 1], [], []>} : vector<8x32xf32>, vector<32x8xf32>, vector<8x8xf32> -> vector<8x8xf32>
    %c0_46 = arith.constant 0 : index
    %c16_47 = arith.constant 16 : index
    %55 = vector.load %arg6[%c0_46, %c16_47] : memref<32x32xf32, #tpu.memory_space<vmem>>, vector<32x8xf32>
    %cst_48 = arith.constant dense<0.000000e+00> : vector<8x8xf32>
    %56 = tpu.matmul %5, %55, %cst_48 {dimension_numbers = #tpu.dot_dimension_numbers<[1], [0], [0], [1], [0, 0, 1, 1], [], []>} : vector<8x32xf32>, vector<32x8xf32>, vector<8x8xf32> -> vector<8x8xf32>
    %cst_49 = arith.constant dense<0.000000e+00> : vector<8x8xf32>
    %57 = tpu.matmul %52, %54, %cst_49 {dimension_numbers = #tpu.dot_dimension_numbers<[1], [1], [0], [0], [0, 0, 1, 0], [], []>} : vector<8x8xf32>, vector<8x8xf32>, vector<8x8xf32> -> vector<8x8xf32>
    %cst_50 = arith.constant 0.353553385 : f32
    %58 = vector.broadcast %cst_50 : f32 to vector<8x8xf32>
    %59 = arith.mulf %57, %58 : vector<8x8xf32>
    %cst_51 = arith.constant dense<0xFF800000> : vector<8xf32>
    %60 = vector.multi_reduction <maximumf>, %59, %cst_51 [1] : vector<8x8xf32> to vector<8xf32>
    %61 = vector.shape_cast %60 : vector<8xf32> to vector<8x1xf32>
    %62 = vector.broadcast %61 : vector<8x1xf32> to vector<8x8xf32>
    %63 = arith.subf %59, %62 : vector<8x8xf32>
    %64 = math.exp %63 : vector<8x8xf32>
    %cst_52 = arith.constant dense<0.000000e+00> : vector<8xf32>
    %65 = vector.multi_reduction <add>, %64, %cst_52 [1] : vector<8x8xf32> to vector<8xf32>
    %66 = vector.shape_cast %65 : vector<8xf32> to vector<8x1xf32>
    %67 = vector.broadcast %66 : vector<8x1xf32> to vector<8x8xf32>
    %68 = arith.divf %64, %67 : vector<8x8xf32>
    %cst_53 = arith.constant dense<0.000000e+00> : vector<8x8xf32>
    %69 = tpu.matmul %68, %56, %cst_53 {dimension_numbers = #tpu.dot_dimension_numbers<[1], [0], [0], [1], [0, 0, 1, 1], [], []>} : vector<8x8xf32>, vector<8x8xf32>, vector<8x8xf32> -> vector<8x8xf32>
    %c16_54 = arith.constant 16 : index
    %c0_55 = arith.constant 0 : index
    %70 = vector.load %arg7[%c16_54, %c0_55] : memref<32x32xf32, #tpu.memory_space<vmem>>, vector<8x32xf32>
    %cst_56 = arith.constant dense<0.000000e+00> : vector<8x32xf32>
    %71 = tpu.matmul %69, %70, %cst_56 {dimension_numbers = #tpu.dot_dimension_numbers<[1], [0], [0], [1], [0, 0, 1, 1], [], []>} : vector<8x8xf32>, vector<8x32xf32>, vector<8x32xf32> -> vector<8x32xf32>
    %72 = arith.addf %50, %71 : vector<8x32xf32>
    %c0_57 = arith.constant 0 : index
    %c24 = arith.constant 24 : index
    %73 = vector.load %arg4[%c0_57, %c24] : memref<32x32xf32, #tpu.memory_space<vmem>>, vector<32x8xf32>
    %cst_58 = arith.constant dense<0.000000e+00> : vector<8x8xf32>
    %74 = tpu.matmul %1, %73, %cst_58 {dimension_numbers = #tpu.dot_dimension_numbers<[1], [0], [0], [1], [0, 0, 1, 1], [], []>} : vector<8x32xf32>, vector<32x8xf32>, vector<8x8xf32> -> vector<8x8xf32>
    %c0_59 = arith.constant 0 : index
    %c24_60 = arith.constant 24 : index
    %75 = vector.load %arg5[%c0_59, %c24_60] : memref<32x32xf32, #tpu.memory_space<vmem>>, vector<32x8xf32>
    %cst_61 = arith.constant dense<0.000000e+00> : vector<8x8xf32>
    %76 = tpu.matmul %3, %75, %cst_61 {dimension_numbers = #tpu.dot_dimension_numbers<[1], [0], [0], [1], [0, 0, 1, 1], [], []>} : vector<8x32xf32>, vector<32x8xf32>, vector<8x8xf32> -> vector<8x8xf32>
    %c0_62 = arith.constant 0 : index
    %c24_63 = arith.constant 24 : index
    %77 = vector.load %arg6[%c0_62, %c24_63] : memref<32x32xf32, #tpu.memory_space<vmem>>, vector<32x8xf32>
    %cst_64 = arith.constant dense<0.000000e+00> : vector<8x8xf32>
    %78 = tpu.matmul %5, %77, %cst_64 {dimension_numbers = #tpu.dot_dimension_numbers<[1], [0], [0], [1], [0, 0, 1, 1], [], []>} : vector<8x32xf32>, vector<32x8xf32>, vector<8x8xf32> -> vector<8x8xf32>
    %cst_65 = arith.constant dense<0.000000e+00> : vector<8x8xf32>
    %79 = tpu.matmul %74, %76, %cst_65 {dimension_numbers = #tpu.dot_dimension_numbers<[1], [1], [0], [0], [0, 0, 1, 0], [], []>} : vector<8x8xf32>, vector<8x8xf32>, vector<8x8xf32> -> vector<8x8xf32>
    %cst_66 = arith.constant 0.353553385 : f32
    %80 = vector.broadcast %cst_66 : f32 to vector<8x8xf32>
    %81 = arith.mulf %79, %80 : vector<8x8xf32>
    %cst_67 = arith.constant dense<0xFF800000> : vector<8xf32>
    %82 = vector.multi_reduction <maximumf>, %81, %cst_67 [1] : vector<8x8xf32> to vector<8xf32>
    %83 = vector.shape_cast %82 : vector<8xf32> to vector<8x1xf32>
    %84 = vector.broadcast %83 : vector<8x1xf32> to vector<8x8xf32>
    %85 = arith.subf %81, %84 : vector<8x8xf32>
    %86 = math.exp %85 : vector<8x8xf32>
    %cst_68 = arith.constant dense<0.000000e+00> : vector<8xf32>
    %87 = vector.multi_reduction <add>, %86, %cst_68 [1] : vector<8x8xf32> to vector<8xf32>
    %88 = vector.shape_cast %87 : vector<8xf32> to vector<8x1xf32>
    %89 = vector.broadcast %88 : vector<8x1xf32> to vector<8x8xf32>
    %90 = arith.divf %86, %89 : vector<8x8xf32>
    %cst_69 = arith.constant dense<0.000000e+00> : vector<8x8xf32>
    %91 = tpu.matmul %90, %78, %cst_69 {dimension_numbers = #tpu.dot_dimension_numbers<[1], [0], [0], [1], [0, 0, 1, 1], [], []>} : vector<8x8xf32>, vector<8x8xf32>, vector<8x8xf32> -> vector<8x8xf32>
    %c24_70 = arith.constant 24 : index
    %c0_71 = arith.constant 0 : index
    %92 = vector.load %arg7[%c24_70, %c0_71] : memref<32x32xf32, #tpu.memory_space<vmem>>, vector<8x32xf32>
    %cst_72 = arith.constant dense<0.000000e+00> : vector<8x32xf32>
    %93 = tpu.matmul %91, %92, %cst_72 {dimension_numbers = #tpu.dot_dimension_numbers<[1], [0], [0], [1], [0, 0, 1, 1], [], []>} : vector<8x8xf32>, vector<8x32xf32>, vector<8x32xf32> -> vector<8x32xf32>
    %94 = arith.addf %72, %93 : vector<8x32xf32>
    %c0_73 = arith.constant 0 : index
    %c0_74 = arith.constant 0 : index
    %c0_75 = arith.constant 0 : index
    %95 = vector.load %arg8[%c0_73, %c0_74, %c0_75] : memref<1x8x32xf32, #tpu.memory_space<vmem>>, vector<1x8x32xf32>
    %96 = vector.shape_cast %95 : vector<1x8x32xf32> to vector<8x32xf32>
    %97 = vector.shape_cast %94 : vector<8x32xf32> to vector<1x8x32xf32>
    tpu.vector_store %arg8[%c0_73, %c0_74, %c0_75], %97 {strides = array<i32>} : memref<1x8x32xf32, #tpu.memory_space<vmem>>, vector<1x8x32xf32>,
    return
  }
  func.func @transform_0(%arg0: i32) -> (i32, i32, i32) {
    %c0_i32 = arith.constant 0 : i32
    %c0_i32_0 = arith.constant 0 : i32
    %c0_i32_1 = arith.constant 0 : i32
    return %arg0, %c0_i32, %c0_i32_0 : i32, i32, i32
  }
  func.func @transform_1(%arg0: i32) -> (i32, i32, i32) {
    %c0_i32 = arith.constant 0 : i32
    %c0_i32_0 = arith.constant 0 : i32
    %c0_i32_1 = arith.constant 0 : i32
    return %arg0, %c0_i32, %c0_i32_0 : i32, i32, i32
  }
  func.func @transform_2(%arg0: i32) -> (i32, i32, i32) {
    %c0_i32 = arith.constant 0 : i32
    %c0_i32_0 = arith.constant 0 : i32
    %c0_i32_1 = arith.constant 0 : i32
    return %arg0, %c0_i32, %c0_i32_0 : i32, i32, i32
  }
  func.func @transform_3(%arg0: i32) -> (i32, i32) {
    %c0_i32 = arith.constant 0 : i32
    %c0_i32_0 = arith.constant 0 : i32
    %c0_i32_1 = arith.constant 0 : i32
    return %c0_i32, %c0_i32_0 : i32, i32
  }
  func.func @transform_4(%arg0: i32) -> (i32, i32) {
    %c0_i32 = arith.constant 0 : i32
    %c0_i32_0 = arith.constant 0 : i32
    %c0_i32_1 = arith.constant 0 : i32
    return %c0_i32, %c0_i32_0 : i32, i32
  }
  func.func @transform_5(%arg0: i32) -> (i32, i32) {
    %c0_i32 = arith.constant 0 : i32
    %c0_i32_0 = arith.constant 0 : i32
    %c0_i32_1 = arith.constant 0 : i32
    return %c0_i32, %c0_i32_0 : i32, i32
  }
  func.func @transform_6(%arg0: i32) -> (i32, i32) {
    %c0_i32 = arith.constant 0 : i32
    %c0_i32_0 = arith.constant 0 : i32
    %c0_i32_1 = arith.constant 0 : i32
    return %c0_i32, %c0_i32_0 : i32, i32
  }
  func.func @transform_7(%arg0: i32) -> (i32, i32, i32) {
    %c0_i32 = arith.constant 0 : i32
    %c0_i32_0 = arith.constant 0 : i32
    %c0_i32_1 = arith.constant 0 : i32
    return %arg0, %c0_i32, %c0_i32_0 : i32, i32, i32
  }
}

</mosaic_0001>

<bundles_post_ra>
// kernel: tpu_custom_call.1
= control target key start
LH: loop header
LB: loop body
LE: loop exit
PB: predicated region body
PF: predicated region fallthrough
CT: control target
= control target key end

     0   :  { %s4031_s0 = inlined_call_operand.hbm [shape: f32[2,8,32], index: 0, kind: input, shape index: {}]   ;;  %s4032_s1 = inlined_call_operand.hbm [shape: f32[2,8,32], index: 1, kind: input, shape index: {}]   ;;  %s4033_s2 = inlined_call_operand.hbm [shape: f32[2,8,32], index: 2, kind: input, shape index: {}]   ;;  %s4034_s3 = inlined_call_operand.hbm [shape: f32[32,32], index: 3, kind: input, shape index: {}]   ;;  %s4035_s4 = inlined_call_operand.hbm [shape: f32[32,32], index: 4, kind: input, shape index: {}]   ;;  %s4036_s5 = inlined_call_operand.hbm [shape: f32[32,32], index: 5, kind: input, shape index: {}]   ;;  %s4037_s6 = inlined_call_operand.hbm [shape: f32[32,32], index: 6, kind: input, shape index: {}]   ;;  %s4038_s7 = inlined_call_operand.hbm [shape: f32[2,8,32], index: 7, kind: output, shape index: {}]  }
   0x1   :  { %4062 = sst [smem:[#allocation25_spill]] %s4032_s1 }
   0x2   :  { %4063 = sst [smem:[#allocation26_spill]] %s4034_s3 }
   0x3   :  { %4064 = sst [smem:[#allocation27_spill]] %s4036_s5 }
   0x4   :  { %4065 = sst [smem:[#allocation28_spill]] %s4038_s7 }
   0x5   :  { %12 = vsyncpa [#allocation3], 0 }
   0x6   :  { %14 = vsyncpa [#allocation3 + $0x1], 0 }
   0x7   :  { %15 = vsyncpa [#allocation6], 0 }
   0x8   :  { %17 = vsyncpa [#allocation6 + $0x1], 0 }
   0x9   :  { %18 = vsyncpa [#allocation9], 0 }
   0xa   :  { %19 = vsyncpa [#allocation12], 0 }
   0xb   :  { %20 = vsyncpa [#allocation4], 0 }
   0xc   :  { %22 = vsyncpa [#allocation4 + $0x1], 0  ;;  %s3473_s24 = smov 0   ;;  %s3475_s25 = smov 0  }
   0xd   :  { %s3477_s26 = smov 0   ;;  %s3479_s27 = smov 0  }
   0xe LB: > { %4066 = sst [smem:[#allocation20_spill]] %s3403_s24  ;;  %s3417_s28 = smov [#allocation8]   ;;  %s3415_s27 = sphi %s3479_s27, %s4103_s27   ;;  %s3411_s26 = sphi %s3477_s26, %s4107_s26   ;;  %s3407_s25 = sphi %s3475_s25, %s4106_s25   ;;  %s3403_s24 = sphi %s3473_s24, %s4105_s24  }
   0xf   : > { %4067 = sst [smem:[#allocation21_spill]] %s3415_s27  ;;  %s233_s29 = sshll.u32 %s3417_s28, 4  ;;  %s3499_s29 = int_to_ptr.vmem [resolvable:$true] %s233_s29 }
  0x10   : > { %s3494_s30 = sadd.s32 4294967295, %s3415_s27   ;;  %p2518_p0 = scmp.ge.s32.totalorder %s3415_s27, 1 }
  0x11   : > { %p4048_p1 = scmp.eq.s32.totalorder %s3494_s30, 0  ;;  %p221_p2 = scmp.lt.s32.totalorder %s3415_s27, 3 }
  0x12   : > { %s3418_s9 = smov [#allocation11]   ;;  %s4070_s3 = sld [smem:[#allocation26_spill]] }
  0x13   : > { %p3501_p3 = pnand %p2518_p0, %p221_p2  ;;  %s259_s10 = sshll.u32 %s3418_s9, 4  ;;  %s3514_s10 = int_to_ptr.vmem [resolvable:$true] %s259_s10 }
  0x15   : > { %s4068_s8 = scalar_select %p3501_p3, 1, 0 }
  0x16   : > { %p2948_p5 = pneg %p3501_p3 }
  0x18   : > { %p3510_p6 = pnand %p2948_p5, %p4048_p1  ;;  %s3135_s14 = scalar_lea.hbm %s4070_s3, 512 }
  0x19   : > { %p3136_p7 = scmp.ne.s32.totalorder %s4070_s3, %s3135_s14  ;;  %p3142_p11 = scmp.lt.u32.totalorder %s3135_s14, %s4070_s3 }
  0x1a   : > { %s4069_s11 = scalar_select %p3510_p6, 1, 0 }
  0x1b   : > { %p3524_p8 = pneg %p3510_p6 }
  0x1d   : > { %s4071_s17 = scalar_select %p3524_p8, 1, 0 }
  0x1e   : > { %p3138_p9 = pnand %p3524_p8, %p3136_p7 }
  0x20   : > { %p3139_p10 = pneg %p3138_p9 }
  0x22   : > { %p3144_p12 = pnand %p3142_p11, %p3139_p10 }
  0x24   : > { %3147 = shalt.err (!%p3144_p12)
}
  0x25   : > { %s3148_s20 = scalar_lea.vmem %s3499_s29, 512  ;;  %p3156_p5 = scmp.lt.s32.totalorder %s3499_s29, %s3499_s29 }
  0x26   : > { %p3149_p13 = scmp.ne.s32.totalorder %s3499_s29, %s3148_s20  ;;  %p3157_p4 = scmp.lt.s32.totalorder %s3148_s20, %s3148_s20 }
  0x28   : > { %p3151_p0 = pnand %p3149_p13, %p3524_p8  ;;  %p3158_p7 = por %p3157_p4, %p3156_p5 }
  0x2a   : > { %p3152_p2 = pneg %p3151_p0 }
  0x2c   : > { %p3159_p9 = pnand %p3158_p7, %p3152_p2 }
  0x2e   : > { %3162 = shalt.err (!%p3159_p9)
}
  0x2f   : > { %s4041_s21 = smov 128   ;;  %s4043_s22 = smov 8  }
  0x30   : > { %2951 = dma.hbm_to_vmem [thread:$0]  (!%p3510_p6), %s4070_s3, 512, %s3499_s29, [#allocation9], %s4041_s21, %s4041_s21, %s4043_s22  }
  0x31   : > { %s4072_s5 = sld [smem:[#allocation27_spill]] }
  0x37   : > { %s3163_s13 = scalar_lea.hbm %s4072_s5, 512 }
  0x38   : > { %p3164_p4 = scmp.ne.s32.totalorder %s4072_s5, %s3163_s13  ;;  %p3170_p12 = scmp.lt.u32.totalorder %s3163_s13, %s4072_s5 }
  0x3a   : > { %p3166_p10 = pnand %p3164_p4, %p3524_p8 }
  0x3c   : > { %p3167_p11 = pneg %p3166_p10 }
  0x3e   : > { %p3172_p13 = pnand %p3170_p12, %p3167_p11 }
  0x40   : > { %3175 = shalt.err (!%p3172_p13)
}
  0x41   : > { %s3176_s29 = scalar_lea.vmem %s3514_s10, 512  ;;  %p3184_p7 = scmp.lt.s32.totalorder %s3514_s10, %s3514_s10 }
  0x42   : > { %p3177_p0 = scmp.ne.s32.totalorder %s3514_s10, %s3176_s29  ;;  %p3185_p9 = scmp.lt.s32.totalorder %s3176_s29, %s3176_s29 }
  0x44   : > { %p3179_p2 = pnand %p3177_p0, %p3524_p8  ;;  %p3186_p4 = por %p3185_p9, %p3184_p7 }
  0x46   : > { %p3180_p5 = pneg %p3179_p2 }
  0x48   : > { %p3187_p10 = pnand %p3186_p4, %p3180_p5 }
  0x4a   : > { %3190 = shalt.err (!%p3187_p10)
}
  0x4b   : > { %2957 = dma.hbm_to_vmem [thread:$0]  (!%p3510_p6), %s4072_s5, 512, %s3514_s10, [#allocation12], %s4041_s21, %s4041_s21, %s4043_s22  }
  0x4c   : > { %s2517_s23 = sadd.s32 4294967294, %s3415_s27   ;;  %s3576_s28 = sadd.s32 1, %s3415_s27  }
  0x4d   : > { %4073 = sst [smem:[#allocation22_spill]] %s3576_s28  ;;  %s32_s9 = ssub.s32 %s3415_s27, %s3576_s28 }
  0x4e   : > { %s35_s12 = sadd.s32 1, %s3411_s26  ;;  %p33_p11 = scmp.eq.s32.totalorder %s32_s9, 0 }
  0x4f   : > { %p42_p12 = scmp.ne.s32.totalorder %s3411_s26, %s3407_s25  ;;  %p43_p13 = scmp.eq.s32.totalorder %s3415_s27, 0 }
  0x50   : > { %p48_p0 = scmp.ne.s32.totalorder %s3407_s25, %s3403_s24  ;;  %p208_p7 = scmp.eq.s32.totalorder %s3494_s30, 1 }
  0x51   : > { %s3587_s13 = scalar_select %p33_p11, %s3411_s26, %s35_s12  }
  0x52   : > { %p44_p2 = por %p43_p13, %p42_p12  ;;  %p3591_p5 = por %p4048_p1, %p48_p0 }
  0x53   : > { %4074 = sst [smem:[#allocation23_spill]] %s3587_s13  ;;  %p214_p9 = scmp.eq.s32.totalorder %s2517_s23, 1 }
  0x54   : > { %s4075_s14 = scalar_select %p3591_p5, 1, 0 }
  0x55   : > { %p2979_p4 = scmp.lt.s32.totalorder %s3415_s27, 2  ;;  %s4040_s10 = sand.u32 1, %s3411_s26  }
  0x56   : > { %p3598_p10 = por %p208_p7, %p42_p12  ;;  %p3602_p3 = por %p214_p9, %p48_p0 }
  0x57   : > { %s3608_s18 = sshll.u32 %s4040_s10, 3  ;;  %s3611_s29 = sshll.u32 %s3415_s27, 7 }
  0x58   : > { %s4076_s15 = scalar_select %p3598_p10, 1, 0 }
  0x59   : > { %s4077_s16 = scalar_select %p3602_p3, 1, 0 }
  0x5a   : > { %p3613_p11 = pnand %p2979_p4, %p44_p2  ;;  %s304_s20 = sand.u32 1, %s3415_s27  }
  0x5b   : > { %4078 = sst [smem:[#allocation24_spill]] %s4077_s16  ;;  %s308_s10 = scalar_lea.vmem [#allocation5], %s3608_s18 }
  0x5c   : > { %s4079_s19 = scalar_select %p3613_p11, 1, 0 }
  0x5d   : > { %s4080_s1 = sld [smem:[#allocation25_spill]]  ;;  %s315_s21 = sshll.u32 %s308_s10, 4  ;;  %s3625_s21 = int_to_ptr.vmem [resolvable:$true] %s315_s21 }
  0x5e   : > { %s3421_s22 = smov [#allocation10]   ;;  %s3629_s5 = scalar_lea.sflag [#allocation6], %s304_s20 }
  0x5f   : > { %s3627_s3 = sshll.u32 %s3421_s22, 4  ;;  %p3635_p13 = pneg %p3613_p11  ;;  %s247_s3 = int_to_ptr.vmem [resolvable:$true] %s3627_s3 }
  0x61   : > { %s4081_s23 = scalar_select %p3635_p13, 1, 0 }
  0x63   : > { %s3622_s12 = scalar_lea.hbm %s4080_s1, %s3611_s29  ;;  %s3196_s28 = scalar_lea.hbm %s4080_s1, 256 }
  0x64   : > { %s3191_s13 = scalar_lea.hbm %s3622_s12, 128  ;;  %p3197_p7 = scmp.lt.u32.totalorder %s3622_s12, %s4080_s1 }
  0x65   : > { %p3192_p12 = scmp.ne.s32.totalorder %s3622_s12, %s3191_s13  ;;  %p3198_p9 = scmp.lt.u32.totalorder %s3196_s28, %s3191_s13 }
  0x66   : > { %p3200_p1 = scmp.lt.u32.totalorder %s3191_s13, %s3622_s12 }
  0x67   : > { %p3194_p0 = pnand %p3635_p13, %p3192_p12  ;;  %p3199_p4 = por %p3198_p9, %p3197_p7 }
  0x69   : > { %p3195_p2 = pneg %p3194_p0  ;;  %p3201_p3 = por %p3200_p1, %p3199_p4 }
  0x6b   : > { %p3202_p10 = pnand %p3201_p3, %p3195_p2 }
  0x6d   : > { %3205 = shalt.err (!%p3202_p10)
}
  0x6e   : > { %s3206_s20 = scalar_lea.vmem %s3625_s21, 128  ;;  %s3422_s9 = smov [#allocation5]  }
  0x6f   : > { %p3207_p12 = scmp.ne.s32.totalorder %s3625_s21, %s3206_s20  ;;  %s3211_s10 = sshll.u32 %s3422_s9, 4  ;;  %s3212_s10 = int_to_ptr.vmem [resolvable:$false] %s3211_s10 }
  0x70   : > { %s3213_s27 = scalar_lea.vmem %s3212_s10, 256  ;;  %p3214_p6 = scmp.lt.s32.totalorder %s3625_s21, %s3212_s10 }
  0x71   : > { %p3209_p0 = pnand %p3207_p12, %p3635_p13  ;;  %p3215_p8 = scmp.lt.s32.totalorder %s3213_s27, %s3206_s20 }
  0x73   : > { %p3210_p5 = pneg %p3209_p0  ;;  %p3216_p7 = por %p3215_p8, %p3214_p6 }
  0x75   : > { %p3217_p9 = pnand %p3216_p7, %p3210_p5 }
  0x77   : > { %3220 = shalt.err (!%p3217_p9)
}
  0x78   : > { %2967 = dma.hbm_to_vmem [thread:$0]  (!%p3613_p11), %s3622_s12, 128, %s3625_s21, %s3629_s5  }
  0x79   : > { %s3221_s22 = scalar_lea.hbm %s4035_s4, 512  ;;  %p4082_p3 = scmp.ne.s32.totalorder %s4071_s17, 0 }
  0x7a   : > { %p3222_p1 = scmp.ne.s32.totalorder %s4035_s4, %s3221_s22  ;;  %p3228_p5 = scmp.lt.u32.totalorder %s3221_s22, %s4035_s4 }
  0x7c   : > { %p3224_p6 = pnand %p3222_p1, %p4082_p3 }
  0x7e   : > { %p3225_p8 = pneg %p3224_p6 }
  0x80   : > { %p3230_p10 = pnand %p3228_p5, %p3225_p8 }
  0x82   : > { %3233 = shalt.err (!%p3230_p10)
}
  0x83   : > { %s3234_s27 = scalar_lea.vmem %s247_s3, 512  ;;  %p3242_p0 = scmp.lt.s32.totalorder %s247_s3, %s247_s3 }
  0x84   : > { %p3235_p2 = scmp.ne.s32.totalorder %s247_s3, %s3234_s27  ;;  %p3243_p7 = scmp.lt.s32.totalorder %s3234_s27, %s3234_s27 }
  0x86   : > { %p3237_p4 = pnand %p3235_p2, %p4082_p3  ;;  %p3244_p9 = por %p3243_p7, %p3242_p0 }
  0x88   : > { %p3238_p12 = pneg %p3237_p4 }
  0x8a   : > { %p3245_p11 = pnand %p3244_p9, %p3238_p12 }
  0x8c   : > { %3248 = shalt.err (!%p3245_p11)
}
  0x8d   : > { %p4083_p1 = scmp.ne.s32.totalorder %s4069_s11, 0  ;;  %s4084_s1 = smov 8  }
  0x8e   : > { %s4085_s21 = smov 128   ;;  %s3423_s13 = smov [#allocation13]  }
  0x8f   : > { %2954 = dma.hbm_to_vmem [thread:$0]  (!%p4083_p1), %s4035_s4, 512, %s247_s3, [#allocation9], %s4085_s21, %s4085_s21, %s4084_s1  }
  0x90   : > { %s272_s22 = sshll.u32 %s3423_s13, 4  ;;  %s3249_s10 = scalar_lea.hbm %s4037_s6, 512  ;;  %s273_s22 = int_to_ptr.vmem [resolvable:$true] %s272_s22 }
  0x91   : > { %p3250_p11 = scmp.ne.s32.totalorder %s4037_s6, %s3249_s10  ;;  %p3256_p5 = scmp.lt.u32.totalorder %s3249_s10, %s4037_s6 }
  0x93   : > { %p3252_p6 = pnand %p3250_p11, %p4082_p3 }
  0x95   : > { %p3253_p8 = pneg %p3252_p6 }
  0x97   : > { %p3258_p10 = pnand %p3256_p5, %p3253_p8 }
  0x99   : > { %3261 = shalt.err (!%p3258_p10)
}
  0x9a   : > { %s3262_s3 = scalar_lea.vmem %s273_s22, 512  ;;  %p3270_p0 = scmp.lt.s32.totalorder %s273_s22, %s273_s22 }
  0x9b   : > { %p3263_p2 = scmp.ne.s32.totalorder %s273_s22, %s3262_s3  ;;  %p3271_p7 = scmp.lt.s32.totalorder %s3262_s3, %s3262_s3 }
  0x9d   : > { %p3265_p4 = pnand %p3263_p2, %p4082_p3  ;;  %p3272_p9 = por %p3271_p7, %p3270_p0 }
  0x9f   : > { %p3266_p12 = pneg %p3265_p4 }
  0xa1   : > { %p3273_p13 = pnand %p3272_p9, %p3266_p12 }
  0xa3   : > { %3276 = shalt.err (!%p3273_p13)
}
  0xa4   : > { %2960 = dma.hbm_to_vmem [thread:$0]  (!%p4083_p1), %s4037_s6, 512, %s273_s22, [#allocation12], %s4085_s21, %s4085_s21, %s4084_s1  }
  0xa5   : > { %s3706_s12 = scalar_lea.hbm %s4031_s0, %s3611_s29  ;;  %s290_s11 = scalar_lea.vmem [#allocation2], %s3608_s18 }
  0xa6   : > { %s297_s28 = sshll.u32 %s290_s11, 4  ;;  %s4086_s13 = sand.u32 1, %s3411_s26   ;;  %s298_s28 = int_to_ptr.vmem [resolvable:$true] %s297_s28 }
  0xa7   : > { %s287_s9 = scalar_lea.sflag [#allocation3], %s4086_s13  ;;  %s3277_s20 = scalar_lea.hbm %s3706_s12, 128 }
  0xa8   : > { %p3278_p13 = scmp.ne.s32.totalorder %s3706_s12, %s3277_s20  ;;  %p4087_p3 = scmp.ne.s32.totalorder %s4081_s23, 0 }
  0xa9   : > { %s3282_s22 = scalar_lea.hbm %s4031_s0, 256  ;;  %p3283_p1 = scmp.lt.u32.totalorder %s3706_s12, %s4031_s0 }
  0xaa   : > { %p3280_p11 = pnand %p3278_p13, %p4087_p3  ;;  %p3284_p8 = scmp.lt.u32.totalorder %s3282_s22, %s3277_s20 }
  0xab   : > { %p3286_p10 = scmp.lt.u32.totalorder %s3277_s20, %s3706_s12 }
  0xac   : > { %p3281_p6 = pneg %p3280_p11  ;;  %p3285_p5 = por %p3284_p8, %p3283_p1 }
  0xae   : > { %p3287_p2 = por %p3286_p10, %p3285_p5 }
  0xb0   : > { %p3288_p4 = pnand %p3287_p2, %p3281_p6 }
  0xb2   : > { %3291 = shalt.err (!%p3288_p4)
}
  0xb3   : > { %s3292_s3 = scalar_lea.vmem %s298_s28, 128  ;;  %s3424_s7 = smov [#allocation2]  }
  0xb4   : > { %p3293_p12 = scmp.ne.s32.totalorder %s298_s28, %s3292_s3  ;;  %s3297_s24 = sshll.u32 %s3424_s7, 4  ;;  %s3298_s24 = int_to_ptr.vmem [resolvable:$false] %s3297_s24 }
  0xb5   : > { %s3299_s17 = scalar_lea.vmem %s3298_s24, 256  ;;  %p3300_p9 = scmp.lt.s32.totalorder %s298_s28, %s3298_s24 }
  0xb6   : > { %p3295_p0 = pnand %p3293_p12, %p4087_p3  ;;  %p3301_p13 = scmp.lt.s32.totalorder %s3299_s17, %s3292_s3 }
  0xb8   : > { %p3296_p7 = pneg %p3295_p0  ;;  %p3302_p11 = por %p3301_p13, %p3300_p9 }
  0xba   : > { %p3303_p1 = pnand %p3302_p11, %p3296_p7 }
  0xbc   : > { %3306 = shalt.err (!%p3303_p1)
}
  0xbd   : > { %p4088_p8 = scmp.ne.s32.totalorder %s4079_s19, 0  ;;  %s3732_s13 = scalar_lea.hbm %s4033_s2, %s3611_s29 }
  0xbe   : > { %s326_s20 = scalar_lea.vmem [#allocation7], %s3608_s18  ;;  %s3307_s21 = scalar_lea.hbm %s3732_s13, 128 }
  0xbf   : > { %2964 = dma.hbm_to_vmem [thread:$0]  (!%p4088_p8), %s3706_s12, 128, %s298_s28, %s287_s9  }
  0xc0   : > { %s333_s1 = sshll.u32 %s326_s20, 4  ;;  %p3308_p6 = scmp.ne.s32.totalorder %s3732_s13, %s3307_s21  ;;  %s334_s1 = int_to_ptr.vmem [resolvable:$true] %s333_s1 }
  0xc1   : > { %s3312_s12 = scalar_lea.hbm %s4033_s2, 256  ;;  %p3313_p2 = scmp.lt.u32.totalorder %s3732_s13, %s4033_s2 }
  0xc2   : > { %p3310_p5 = pnand %p3308_p6, %p4087_p3  ;;  %p3314_p4 = scmp.lt.u32.totalorder %s3312_s12, %s3307_s21 }
  0xc3   : > { %p3316_p0 = scmp.lt.u32.totalorder %s3307_s21, %s3732_s13 }
  0xc4   : > { %p3311_p10 = pneg %p3310_p5  ;;  %p3315_p12 = por %p3314_p4, %p3313_p2 }
  0xc6   : > { %p3317_p7 = por %p3316_p0, %p3315_p12 }
  0xc8   : > { %p3318_p9 = pnand %p3317_p7, %p3311_p10 }
  0xca   : > { %3321 = shalt.err (!%p3318_p9)
}
  0xcb   : > { %s3322_s18 = scalar_lea.vmem %s334_s1, 128  ;;  %s3425_s29 = smov [#allocation7]  }
  0xcc   : > { %p3323_p13 = scmp.ne.s32.totalorder %s334_s1, %s3322_s18  ;;  %s3327_s27 = sshll.u32 %s3425_s29, 4  ;;  %s3328_s27 = int_to_ptr.vmem [resolvable:$false] %s3327_s27 }
  0xcd   : > { %s3329_s3 = scalar_lea.vmem %s3328_s27, 256  ;;  %p3330_p6 = scmp.lt.s32.totalorder %s334_s1, %s3328_s27 }
  0xce   : > { %p3325_p11 = pnand %p3323_p13, %p4087_p3  ;;  %p3331_p5 = scmp.lt.s32.totalorder %s3329_s3, %s3322_s18 }
  0xd0   : > { %p3326_p1 = pneg %p3325_p11  ;;  %p3332_p8 = por %p3331_p5, %p3330_p6 }
  0xd2   : > { %p3333_p2 = pnand %p3332_p8, %p3326_p1 }
  0xd4   : > { %3336 = shalt.err (!%p3333_p2)
}
  0xd5   : > { %p4089_p4 = scmp.ne.s32.totalorder %s4079_s19, 0  ;;  %p4090_p10 = scmp.ne.s32.totalorder %s4068_s8, 0 }
  0xd6   : > { %s3756_s23 = sand.u32 (!%p4090_p10), 1, %s3407_s25   ;;  %p4091_p3 = scmp.ne.s32.totalorder (!%p4090_p10), %s4075_s14, 0 }
  0xd7   : > { %2970 = dma.hbm_to_vmem [thread:$0]  (!%p4089_p4), %s3732_s13, 128, %s334_s1, %s3629_s5  }
  0xd8   : > { %342 = sbr.rel (%p4090_p10) target bundleno = 4100 (0x1004), region = 48  ;;  %s3759_s7 = sshll.u32 (!%p4090_p10), %s3756_s23, 3 }
  0xd9   : > { %s345_s24 = scalar_lea.sflag (!%p4090_p10), [#allocation3], %s3756_s23  ;;  %s348_s17 = scalar_lea.vmem (!%p4090_p10), [#allocation2], %s3759_s7 }
  0xdf   : > { %3382 = dma.done.wait (%p4091_p3), %s345_s24, 128  }
  0xe0   : > { %3384 = vsyncadd (%p4091_p3), %s345_s24, 4294967168  ;;  %s353_s5 = sand.u32 1, %s3494_s30   ;;  %s357_s19 = scalar_lea.vmem [#allocation5], %s3759_s7 }
  0xe1   : > { %s354_s8 = scalar_lea.sflag [#allocation6], %s353_s5 }
  0xe2   : > { %3386 = dma.done.wait (%p4091_p3), %s354_s8, 256  }
  0xe3   : > { %3388 = vsyncadd (%p4091_p3), %s354_s8, 4294967040  ;;  %s366_s16 = scalar_lea.vmem [#allocation7], %s3759_s7  ;;  %p4092_p8 = scmp.eq.s32.totalorder %s3494_s30, 0 }
  0xe5   : > { %3390 = dma.done.wait (%p4092_p8), [#allocation9], 1024   ;;  %p4093_p12 = pmov %p4092_p8 }
  0xe6   : > { %p4094_p0 = pmov %p4092_p8 }
  0xe7   : > { %3392 = vsyncadd (%p4093_p12), [#allocation9], 4294966272 }
  0xe8   : > { %3394 = dma.done.wait (%p4094_p0), [#allocation12], 1024   ;;  %p4095_p7 = pmov %p4094_p0 }
  0xe9   : > { %v3426_v0 = vmov 0.0|0.0   ;;  %vm3427_vm0 = vmmov 0   ;;  %v3428_v1 = vmov 0.0   ;;  %v504_v2 = vld [vmem:[#allocation10] sm:$0xff]  ;;  %v505_v3 = vld [vmem:[#allocation10 + $0x8] sm:$0xff]  ;;  %v3788_v7 = vld [vmem:[#allocation10 + $0x10] sm:$0xff] }
  0xea   : > { %3396 = vsyncadd (%p4095_p7), [#allocation12], 4294966272  ;;  %2853 = vmatprep.subr.bf16.mxu1 %v3426_v0  ;;  %2847 = vmatprep.subr.bf16.mxu0 %v3426_v0  ;;  %v426_v4 = vld [vmem:[#allocation8] sm:$0xff]  ;;  %v2854_v5 = vpack.c.bf16 %v505_v3, %v504_v2  ;;  %v427_v6 = vld [vmem:[#allocation8 + $0x8] sm:$0xff]  ;;  %vm430_vm1 = vcmask 261120   ;;  %vm658_vm2 = vcmask 64512   ;;  %v3827_v31 = vpack.i.bf16 %v505_v3, %v504_v2 }
  0xeb   : > { %2674 = vmatprep.mubr.msk.f32.mxu1 %vm3427_vm0, %v3428_v1  ;;  %2663 = vmatprep.mubr.msk.f32.mxu0 %vm3427_vm0, %v3428_v1  ;;  %v507_v8 = vld [vmem:[#allocation10 + $0x18] sm:$0xff]  ;;  %v2848_v9 = vpack.c.bf16 %v427_v6, %v426_v4  ;;  %v428_v10 = vld [vmem:[#allocation8 + $0x10] sm:$0xff]  ;;  %v3795_v14 = vld [vmem:[%s357_s19] sm:$0xff]  ;;  %s3429_s14 = smov 120   ;;  %v3831_v32 = vpack.i.bf16 %v427_v6, %v426_v4  ;;  %s3430_s11 = smov 112  }
  0xec   : > { %v429_v11 = vld [vmem:[#allocation8 + $0x18] sm:$0xff]  ;;  %2855 = vmatpush3.bf16.msra.mxu1 %v2854_v5  ;;  %v2857_v12 = vpack.c.bf16 %v507_v8, %v3788_v7  ;;  %v581_v20 = vld [vmem:[#allocation11] sm:$0xff]  ;;  %v582_v21 = vld [vmem:[#allocation11 + $0x8] sm:$0xff]  ;;  %3030 = vrot.lane.b32.xlu1 %v3827_v31, %s3429_s14  ;;  %v3841_v39 = vpack.i.bf16 %v507_v8, %v3788_v7  ;;  %s3431_s13 = smov 104   ;;  %s2568_s20 = sshll.u32 %s3494_s30, 7 }
  0xed   : > { %2849 = vmatpush3.bf16.msra.mxu0 %v2848_v9  ;;  %2856 = vmatprep.subr.bf16.mxu1 %v3426_v0  ;;  %v2851_v13 = vpack.c.bf16 %v429_v11, %v428_v10  ;;  %v3799_v15 = vld [vmem:[%s348_s17] sm:$0xff]  ;;  %v2860_v23 = vpack.c.bf16 %v582_v21, %v581_v20  ;;  %v3835_v33 = vpack.i.bf16 %v429_v11, %v428_v10  ;;  %v820_v9 = vld [vmem:[#allocation13] sm:$0xff]  ;;  %s422_s1 = scalar_lea.vmem [#allocation14], %s3759_s7  ;;  %s4096_s12 = sld [smem:[#allocation28_spill]] }
  0xee   : > { %2850 = vmatprep.subr.bf16.mxu0 %v3426_v0  ;;  %v583_v22 = vld [vmem:[#allocation11 + $0x10] sm:$0xff]  ;;  %v584_v24 = vld [vmem:[#allocation11 + $0x18] sm:$0xff]  ;;  %v3848_v51 = vpack.i.bf16 %v582_v21, %v581_v20  ;;  %s2366_s21 = sshll.u32 %s422_s1, 4  ;;  %s2353_s9 = scalar_lea.sflag [#allocation4], %s3756_s23  ;;  %s3988_s21 = int_to_ptr.vmem [resolvable:$true] %s2366_s21 }
  0xef   : > { %v2863_v25 = vpack.c.bf16 %v584_v24, %v583_v22  ;;  %v3819_v26 = vld [vmem:[%s366_s16] sm:$0xff]  ;;  %v3854_v52 = vpack.i.bf16 %v584_v24, %v583_v22  ;;  %s3337_s30 = scalar_lea.vmem %s3988_s21, 128  ;;  %p4097_p13 = scmp.ne.s32.totalorder %s4076_s15, 0 }
  0xf0   : > { %2858 = vmatpush3.bf16.msra.mxu1 %v2857_v12  ;;  %3035 = vrot.lane.b32.xlu1 %v3831_v32, %s3429_s14  ;;  %p3338_p9 = scmp.ne.s32.totalorder %s3988_s21, %s3337_s30  ;;  %s3432_s18 = smov [#allocation14]  }
  0xf1   : > { %2852 = vmatpush3.bf16.msra.mxu0 %v2851_v13  ;;  %2688 = vmatprep.subr.mxu1 %v3428_v1  ;;  %s3341_s29 = sshll.u32 %s3432_s18, 4  ;;  %s3342_s29 = int_to_ptr.vmem [resolvable:$false] %s3341_s29 }
  0xf2   : > { %2859 = vmatprep.subr.bf16.mxu0 %v3426_v0  ;;  %p3339_p11 = pnand %p3338_p9, %p4097_p13  ;;  %s3343_s27 = scalar_lea.vmem %s3342_s29, 256 }
  0xf3   : > { %2675 = vmatmul.mubr.msk.f32.vlgmr.msra.gmra.mrb[0].mxu1 %vm430_vm1, %v3795_v14  ;;  %s3986_s28 = scalar_lea.hbm %s4096_s12, %s2568_s20  ;;  %p3344_p6 = scmp.lt.s32.totalorder %s3988_s21, %s3342_s29 }
  0xf4   : > { %2664 = vmatmul.mubr.msk.f32.vlgmr.msra.gmra.mrb[0].mxu0 %vm430_vm1, %v3799_v15  ;;  %2690 = vmatprep.mubr.msk.f32.mxu1 %vm3427_vm0, %v3428_v1  ;;  %p3340_p1 = pneg %p3339_p11  ;;  %p3345_p5 = scmp.lt.s32.totalorder %s3343_s27, %s3337_s30 }
  0xf5   : > { %2685 = vmatprep.mubr.msk.f32.mxu0 %vm3427_vm0, %v3428_v1  ;;  %2861 = vmatpush3.bf16.msra.mxu0 %v2860_v23 }
  0xf6   : > { %2862 = vmatprep.subr.bf16.mxu0 %v3426_v0  ;;  %3045 = vrot.lane.b32.xlu1 %v3835_v33, %s3429_s14  ;;  %p3346_p2 = por %p3345_p5, %p3344_p6 }
  0xf8   : > { %p3347_p4 = pnand %p3346_p2, %p3340_p1 }
  0xf9   : > { %2864 = vmatpush3.bf16.msra.mxu0 %v2863_v25 }
  0xfa   : > { %2865 = vmatprep.subr.bf16.mxu0 %v3426_v0  ;;  %3050 = vrot.lane.b32.xlu1 %v3848_v51, %s3429_s14 }
  0xfc   : > { %2686 = vmatmul.mubr.msk.f32.vlgmr.msra.gmra.mrb[2].mxu0 %vm430_vm1, %v3819_v26 }
  0xfd   : > { %2706 = vmatprep.mubr.msk.f32.mxu0 %vm3427_vm0, %v3428_v1 }
  0xfe   : > { %3055 = vrot.lane.b32.xlu1 %v3854_v52, %s3429_s14 }
 0x15e   : > { %v3031_v40 = vpop.permute.xlu1 %3030 }
 0x15f   : > { %v3033_v54 = vunpack.i.h.bf16 %v3031_v40  ;;  %v3032_v55 = vunpack.i.l.bf16 %v3031_v40 }
 0x161   : > { %v2872_v57 = vpack.c.bf16 %v3033_v54, %v3032_v55 }
 0x162   : > { %v3036_v43 = vpop.permute.xlu1 %3035 }
 0x163   : > { %v3038_v44 = vunpack.i.h.bf16 %v3036_v43  ;;  %v3037_v45 = vunpack.i.l.bf16 %v3036_v43 }
 0x165   : > { %v2866_v46 = vpack.c.bf16 %v3038_v44, %v3037_v45  ;;  %v1240_v45 = vld [vmem:[#allocation13 + $0x8] sm:$0xff] }
 0x167   : > { %2867 = vmatpush3.bf16.msra.mxu0 %v2866_v46 }
 0x168   : > { %v3046_v47 = vpop.permute.xlu1 %3045  ;;  %2868 = vmatprep.subr.bf16.mxu0 %v3426_v0 }
 0x169   : > { %v3048_v48 = vunpack.i.h.bf16 %v3046_v47  ;;  %v3047_v49 = vunpack.i.l.bf16 %v3046_v47 }
 0x16b   : > { %v2869_v50 = vpack.c.bf16 %v3048_v48, %v3047_v49 }
 0x16c   : > { %v3051_v58 = vpop.permute.xlu1 %3050 }
 0x16d   : > { %2870 = vmatpush3.bf16.msra.mxu0 %v2869_v50  ;;  %v3053_v62 = vunpack.i.h.bf16 %v3051_v58  ;;  %v3052_v63 = vunpack.i.l.bf16 %v3051_v58 }
 0x16e   : > { %2877 = vmatprep.subr.bf16.mxu0 %v3426_v0 }
 0x16f   : > { %v2878_v3 = vpack.c.bf16 %v3053_v62, %v3052_v63 }
 0x170   : > { %2707 = vmatmul.mubr.msk.f32.vlgmr.msra.gmra.mrb[4].mxu0 %vm430_vm1, %v3799_v15  ;;  %v3056_v4 = vpop.permute.xlu1 %3055 }
 0x171   : > { %2728 = vmatprep.mubr.msk.f32.mxu0 %vm3427_vm0, %v3428_v1  ;;  %v3058_v6 = vunpack.i.h.bf16 %v3056_v4  ;;  %v3057_v7 = vunpack.i.l.bf16 %v3056_v4  ;;  %2879 = vmatpush3.bf16.msra.mxu0 %v2878_v3 }
 0x172   : > { %2880 = vmatprep.subr.bf16.mxu0 %v3426_v0 }
 0x173   : > { %v2881_v8 = vpack.c.bf16 %v3058_v6, %v3057_v7 }
 0x175   : > { %2882 = vmatpush3.bf16.msra.mxu0 %v2881_v8 }
 0x176   : > { %2746 = vmatprep.subr.mxu0 %v3428_v1 }
 0x178   : > { %2729 = vmatmul.mubr.msk.f32.vlgmr.msra.gmra.mrb[6].mxu0 %vm430_vm1, %v3819_v26 }
 0x179   : > { %2748 = vmatprep.mubr.msk.f32.mxu0 %vm3427_vm0, %v3428_v1  ;;  %2747 = vmatpush3.msra.mxu0 %v820_v9 }
 0x17a   : > { %2889 = vmatprep.subr.bf16.mxu0 %v3426_v0 }
 0x1c6   : > { %v577_v16 = vpop.f32.mrb[0].mxu1 }
 0x1c7   : > { %v2676_v17 = vpop.f32.mrb[1].mxu1  ;;  %2689 = vmatpush3.xpose.msk.msra.mxu1 %vm658_vm2, %v577_v16  ;;  %v500_v18 = vpop.f32.mrb[0].mxu0 }
 0x1c8   : > { %v2665_v19 = vpop.f32.mrb[1].mxu0  ;;  %2693 = vmatprep.subr.mxu1 %v3428_v1 }
 0x1ca   : > { %2691 = vmatmul.mubr.msk.f32.vlgmr.msra.gmra.mrb[2].mxu1 %vm658_vm2, %v500_v18 }
 0x1cb   : > { %2695 = vmatprep.mubr.msk.f32.mxu1 %vm3427_vm0, %v3428_v1 }
 0x1cf   : > { %v654_v41 = vpop.f32.mrb[2].mxu0 }
 0x1d0   : > { %v2687_v42 = vpop.f32.mrb[3].mxu0  ;;  %2694 = vmatpush3.msra.mxu1 %v654_v41 }
 0x1d1   : > { %2871 = vmatprep.subr.bf16.mxu1 %v3426_v0 }
 0x243   : > { %v903_v10 = vpop.f32.mrb[4].mxu0 }
 0x244   : > { %v2708_v11 = vpop.f32.mrb[5].mxu0 }
 0x29d   : > { %v731_v27 = vpop.f32.mrb[2].mxu1 }
 0x29e   : > { %v735_v28 = vmul.f32 0.35355338, %v731_v27  ;;  %v2692_v29 = vpop.f32.mrb[3].mxu1 }
 0x2a0   : > { %v736_v30 = vsel %vm658_vm2, %v735_v28, -inf }
 0x2a1   : > { %737 = vmax.xlane.f32.xlu0 %v736_v30 }
 0x32e   : > { %v738_v34 = vpop.xlane.xlu0 %737 }
 0x32f   : > { %v739_v35 = vsub.f32 %v735_v28, %v738_v34  ;;  %v1075_v28 = vpop.f32.mrb[6].mxu0 }
 0x330   : > { %v2730_v29 = vpop.f32.mrb[7].mxu0 }
 0x331   : > { %v740_v36 = vmul.f32 1.442695, %v739_v35 }
 0x333   : > { %3119 = vpow2.f32 %v740_v36 }
 0x33d   : > { %v3120_v37 = vpop.eup %3119 }
 0x33e   : > { %v742_v38 = vsel %vm658_vm2, %v3120_v37, 0.0 }
 0x33f   : > { %743 = vadd.xlane.f32.xlu0 %v742_v38 }
 0x355   : > { %3040 = vrot.lane.b32.xlu0 %v3841_v39, %s3429_s14 }
 0x3cc   : > { %v744_v53 = vpop.xlane.xlu0 %743 }
 0x3cd   : > { %3121 = vrcp.f32 %v744_v53 }
 0x3d0   : > { %v3041_v56 = vpop.permute.xlu0 %3040 }
 0x3d1   : > { %v3043_v60 = vunpack.i.h.bf16 %v3041_v56  ;;  %v3042_v61 = vunpack.i.l.bf16 %v3041_v56 }
 0x3d3   : > { %v2875_v5 = vpack.c.bf16 %v3043_v60, %v3042_v61 }
 0x3d7   : > { %v3122_v59 = vpop.eup %3121 }
 0x3d8   : > { %v746_v2 = vmul.f32 %v3122_v59, %v3120_v37 }
 0x3da   : > { %2696 = vmatmul.mubr.msk.f32.vlgmr.msra.gmra.mrb[4].mxu1 %vm658_vm2, %v746_v2 }
 0x3db   : > { %2873 = vmatpush3.bf16.msra.mxu1 %v2872_v57  ;;  %2717 = vmatprep.mubr.msk.f32.mxu1 %vm3427_vm0, %v3428_v1 }
 0x3dc   : > { %2874 = vmatprep.subr.bf16.mxu1 %v3426_v0 }
 0x3df   : > { %2876 = vmatpush3.bf16.msra.mxu1 %v2875_v5 }
 0x3e0   : > { %2731 = vmatprep.subr.mxu1 %v3428_v1 }
 0x3e2   : > { %2718 = vmatmul.mubr.msk.f32.vlgmr.msra.gmra.mrb[6].mxu1 %vm430_vm1, %v3795_v14 }
 0x3e3   : > { %2733 = vmatprep.mubr.msk.f32.mxu1 %vm3427_vm0, %v3428_v1 }
 0x4ad   : > { %v816_v12 = vpop.f32.mrb[4].mxu1 }
 0x4ae   : > { %v2697_v13 = vpop.f32.mrb[5].mxu1  ;;  %2749 = vmatmul.mubr.msk.f32.vlgmr.msra.gmra.mrb[8].mxu0 %vm658_vm2, %v816_v12 }
 0x4af   : > { %2770 = vmatprep.mubr.msk.f32.mxu0 %vm3427_vm0, %v3428_v1 }
 0x4b5   : > { %v989_v16 = vpop.f32.mrb[6].mxu1 }
 0x4b6   : > { %v2719_v17 = vpop.f32.mrb[7].mxu1  ;;  %2732 = vmatpush3.xpose.msk.msra.mxu1 %vm658_vm2, %v989_v16 }
 0x4b7   : > { %2736 = vmatprep.subr.mxu1 %v3428_v1 }
 0x4b9   : > { %2734 = vmatmul.mubr.msk.f32.vlgmr.msra.gmra.mrb[8].mxu1 %vm658_vm2, %v903_v10 }
 0x4ba   : > { %2738 = vmatprep.mubr.msk.f32.mxu1 %vm3427_vm0, %v3428_v1  ;;  %2737 = vmatpush3.msra.mxu1 %v1075_v28 }
 0x4bb   : > { %2741 = vmatprep.subr.mxu1 %v3428_v1 }
 0x58c   : > { %v1151_v18 = vpop.f32.mrb[8].mxu1 }
 0x58d   : > { %v1155_v19 = vmul.f32 0.35355338, %v1151_v18  ;;  %v2735_v20 = vpop.f32.mrb[9].mxu1 }
 0x58f   : > { %v1156_v21 = vsel %vm658_vm2, %v1155_v19, -inf }
 0x590   : > { %1157 = vmax.xlane.f32.xlu1 %v1156_v21 }
 0x5a1   : > { %3060 = vrot.lane.b32.xlu1 %v3827_v31, %s3430_s11 }
 0x5a5   : > { %3070 = vrot.lane.b32.xlu1 %v3841_v39, %s3430_s11 }
 0x5a9   : > { %3075 = vrot.lane.b32.xlu1 %v3835_v33, %s3430_s11 }
 0x5ad   : > { %3080 = vrot.lane.b32.xlu1 %v3848_v51, %s3430_s11 }
 0x61d   : > { %v1158_v22 = vpop.xlane.xlu1 %1157 }
 0x61e   : > { %v1159_v23 = vsub.f32 %v1155_v19, %v1158_v22 }
 0x620   : > { %v1160_v24 = vmul.f32 1.442695, %v1159_v23  ;;  %v1794_v23 = vld [vmem:[#allocation13 + $0x10] sm:$0xff] }
 0x621   : > { %v3061_v34 = vpop.permute.xlu1 %3060 }
 0x622   : > { %3123 = vpow2.f32 %v1160_v24  ;;  %v3063_v35 = vunpack.i.h.bf16 %v3061_v34  ;;  %v3062_v36 = vunpack.i.l.bf16 %v3061_v34 }
 0x624   : > { %v2890_v37 = vpack.c.bf16 %v3063_v35, %v3062_v36 }
 0x625   : > { %v3071_v38 = vpop.permute.xlu1 %3070 }
 0x626   : > { %v3073_v40 = vunpack.i.h.bf16 %v3071_v38  ;;  %v3072_v41 = vunpack.i.l.bf16 %v3071_v38  ;;  %2891 = vmatpush3.bf16.msra.mxu0 %v2890_v37 }
 0x627   : > { %2892 = vmatprep.subr.bf16.mxu0 %v3426_v0 }
 0x628   : > { %v2893_v42 = vpack.c.bf16 %v3073_v40, %v3072_v41 }
 0x629   : > { %v3076_v49 = vpop.permute.xlu1 %3075 }
 0x62a   : > { %2894 = vmatpush3.bf16.msra.mxu0 %v2893_v42  ;;  %v3078_v53 = vunpack.i.h.bf16 %v3076_v49  ;;  %v3077_v54 = vunpack.i.l.bf16 %v3076_v49 }
 0x62b   : > { %2784 = vmatprep.subr.mxu0 %v3428_v1 }
 0x62c   : > { %v3124_v25 = vpop.eup %3123  ;;  %v2887_v57 = vpack.c.bf16 %v3078_v53, %v3077_v54 }
 0x62d   : > { %v1162_v27 = vsel %vm658_vm2, %v3124_v25, 0.0  ;;  %2771 = vmatmul.mubr.msk.f32.vlgmr.msra.gmra.mrb[10].mxu0 %vm430_vm1, %v3795_v14  ;;  %v3081_v2 = vpop.permute.xlu1 %3080 }
 0x62e   : > { %1163 = vadd.xlane.f32.xlu0 %v1162_v27  ;;  %2786 = vmatprep.mubr.msk.f32.mxu0 %vm3427_vm0, %v3428_v1  ;;  %v3083_v4 = vunpack.i.h.bf16 %v3081_v2  ;;  %v3082_v5 = vunpack.i.l.bf16 %v3081_v2 }
 0x630   : > { %v2896_v8 = vpack.c.bf16 %v3083_v4, %v3082_v5 }
 0x644   : > { %3065 = vrot.lane.b32.xlu0 %v3831_v32, %s3430_s11 }
 0x648   : > { %3085 = vrot.lane.b32.xlu0 %v3854_v52, %s3430_s11 }
 0x6bb   : > { %v1164_v30 = vpop.xlane.xlu0 %1163 }
 0x6bc   : > { %3125 = vrcp.f32 %v1164_v30 }
 0x6bf   : > { %v3066_v46 = vpop.permute.xlu0 %3065 }
 0x6c0   : > { %v3068_v47 = vunpack.i.h.bf16 %v3066_v46  ;;  %v3067_v48 = vunpack.i.l.bf16 %v3066_v46 }
 0x6c2   : > { %v2884_v50 = vpack.c.bf16 %v3068_v47, %v3067_v48 }
 0x6c3   : > { %v3086_v3 = vpop.permute.xlu0 %3085 }
 0x6c4   : > { %v3088_v6 = vunpack.i.h.bf16 %v3086_v3  ;;  %v3087_v7 = vunpack.i.l.bf16 %v3086_v3 }
 0x6c6   : > { %v3126_v43 = vpop.eup %3125  ;;  %v2899_v9 = vpack.c.bf16 %v3088_v6, %v3087_v7  ;;  %v2276_v7 = vld [vmem:[#allocation13 + $0x18] sm:$0xff] }
 0x6c7   : > { %v1166_v44 = vmul.f32 %v3126_v43, %v3124_v25 }
 0x6c9   : > { %2739 = vmatmul.mubr.msk.f32.vlgmr.msra.gmra.mrb[10].mxu1 %vm658_vm2, %v1166_v44 }
 0x6ca   : > { %2742 = vmatpush3.msra.mxu1 %v1240_v45  ;;  %2743 = vmatprep.mubr.msk.f32.mxu1 %vm3427_vm0, %v3428_v1 }
 0x6cb   : > { %2883 = vmatprep.subr.bf16.mxu1 %v3426_v0 }
 0x700   : > { %v1547_v58 = vpop.f32.mrb[10].mxu0 }
 0x701   : > { %v2772_v59 = vpop.f32.mrb[11].mxu0  ;;  %2785 = vmatpush3.xpose.msk.msra.mxu0 %vm658_vm2, %v1547_v58 }
 0x702   : > { %2794 = vmatprep.subr.mxu0 %v3428_v1 }
 0x79c   : > { %v1236_v55 = vpop.f32.mrb[10].mxu1 }
 0x79d   : > { %v2740_v56 = vpop.f32.mrb[11].mxu1  ;;  %2744 = vmatmul.mubr.msk.f32.vlgmr.msra.gmra.mrb[12].mxu1 %vm658_vm2, %v1236_v55 }
 0x79e   : > { %2885 = vmatpush3.bf16.msra.mxu1 %v2884_v50  ;;  %2759 = vmatprep.mubr.msk.f32.mxu1 %vm3427_vm0, %v3428_v1 }
 0x79f   : > { %2886 = vmatprep.subr.bf16.mxu1 %v3426_v0 }
 0x7a2   : > { %2888 = vmatpush3.bf16.msra.mxu1 %v2887_v57 }
 0x7a3   : > { %2895 = vmatprep.subr.bf16.mxu1 %v3426_v0 }
 0x7a5   : > { %2760 = vmatmul.mubr.msk.f32.vlgmr.msra.gmra.mrb[14].mxu1 %vm430_vm1, %v3799_v15 }
 0x7a6   : > { %2781 = vmatprep.mubr.msk.f32.mxu1 %vm3427_vm0, %v3428_v1  ;;  %2897 = vmatpush3.bf16.msra.mxu1 %v2896_v8 }
 0x7a7   : > { %2898 = vmatprep.subr.bf16.mxu1 %v3426_v0 }
 0x7aa   : > { %2900 = vmatpush3.bf16.msra.mxu1 %v2899_v9 }
 0x7ab   : > { %2789 = vmatprep.subr.mxu1 %v3428_v1 }
 0x7ad   : > { %2782 = vmatmul.mubr.msk.f32.vlgmr.msra.gmra.mrb[16].mxu1 %vm430_vm1, %v3819_v26 }
 0x7ae   : > { %2791 = vmatprep.mubr.msk.f32.mxu1 %vm3427_vm0, %v3428_v1 }
 0x870   : > { %v3920_v60 = vpop.f32.mrb[12].mxu1 }
 0x871   : > { %v2745_v61 = vpop.f32.mrb[13].mxu1 }
 0x878   : > { %v1465_v62 = vpop.f32.mrb[14].mxu1 }
 0x879   : > { %v2761_v63 = vpop.f32.mrb[15].mxu1  ;;  %2787 = vmatmul.mubr.msk.f32.vlgmr.msra.gmra.mrb[12].mxu0 %vm658_vm2, %v1465_v62 }
 0x87a   : > { %2796 = vmatprep.mubr.msk.f32.mxu0 %vm3427_vm0, %v3428_v1  ;;  %2795 = vmatpush3.msra.mxu0 %v1794_v23 }
 0x87b   : > { %2907 = vmatprep.subr.bf16.mxu0 %v3426_v0 }
 0x880   : > { %v1629_v21 = vpop.f32.mrb[16].mxu1 }
 0x881   : > { %v2783_v22 = vpop.f32.mrb[17].mxu1  ;;  %2790 = vmatpush3.msra.mxu1 %v1629_v21 }
 0x882   : > { %2901 = vmatprep.subr.bf16.mxu1 %v3426_v0 }
 0x94c   : > { %v1705_v10 = vpop.f32.mrb[12].mxu0 }
 0x94d   : > { %v1709_v11 = vmul.f32 0.35355338, %v1705_v10  ;;  %v2788_v12 = vpop.f32.mrb[13].mxu0 }
 0x94f   : > { %v1710_v13 = vsel %vm658_vm2, %v1709_v11, -inf }
 0x950   : > { %1711 = vmax.xlane.f32.xlu1 %v1710_v13 }
 0x961   : > { %3095 = vrot.lane.b32.xlu1 %v3831_v32, %s3431_s13 }
 0x965   : > { %3100 = vrot.lane.b32.xlu1 %v3841_v39, %s3431_s13 }
 0x969   : > { %3110 = vrot.lane.b32.xlu1 %v3848_v51, %s3431_s13 }
 0x9dd   : > { %v1712_v16 = vpop.xlane.xlu1 %1711 }
 0x9de   : > { %v1713_v17 = vsub.f32 %v1709_v11, %v1712_v16 }
 0x9e0   : > { %v1714_v18 = vmul.f32 1.442695, %v1713_v17 }
 0x9e1   : > { %v3096_v25 = vpop.permute.xlu1 %3095 }
 0x9e2   : > { %3127 = vpow2.f32 %v1714_v18  ;;  %v3098_v27 = vunpack.i.h.bf16 %v3096_v25  ;;  %v3097_v28 = vunpack.i.l.bf16 %v3096_v25 }
 0x9e4   : > { %v2902_v30 = vpack.c.bf16 %v3098_v27, %v3097_v28 }
 0x9e5   : > { %v3101_v38 = vpop.permute.xlu1 %3100 }
 0x9e6   : > { %v3103_v41 = vunpack.i.h.bf16 %v3101_v38  ;;  %v3102_v42 = vunpack.i.l.bf16 %v3101_v38 }
 0x9e8   : > { %v2911_v45 = vpack.c.bf16 %v3103_v41, %v3102_v42 }
 0x9ec   : > { %v3128_v19 = vpop.eup %3127 }
 0x9ed   : > { %v1716_v20 = vsel %vm658_vm2, %v3128_v19, 0.0 }
 0x9ee   : > { %1717 = vadd.xlane.f32.xlu0 %v1716_v20 }
 0xa04   : > { %3090 = vrot.lane.b32.xlu0 %v3827_v31, %s3431_s13 }
 0xa08   : > { %3105 = vrot.lane.b32.xlu0 %v3835_v33, %s3431_s13 }
 0xa0c   : > { %3115 = vrot.lane.b32.xlu0 %v3854_v52, %s3431_s13 }
 0xa7b   : > { %v1718_v24 = vpop.xlane.xlu0 %1717 }
 0xa7c   : > { %3129 = vrcp.f32 %v1718_v24 }
 0xa7f   : > { %v3091_v31 = vpop.permute.xlu0 %3090 }
 0xa80   : > { %v3093_v36 = vunpack.i.h.bf16 %v3091_v31  ;;  %v3092_v37 = vunpack.i.l.bf16 %v3091_v31 }
 0xa82   : > { %v2908_v40 = vpack.c.bf16 %v3093_v36, %v3092_v37 }
 0xa83   : > { %v3106_v32 = vpop.permute.xlu0 %3105 }
 0xa84   : > { %v3108_v39 = vunpack.i.h.bf16 %v3106_v32  ;;  %v3107_v33 = vunpack.i.l.bf16 %v3106_v32 }
 0xa86   : > { %v3130_v29 = vpop.eup %3129  ;;  %v2905_v35 = vpack.c.bf16 %v3108_v39, %v3107_v33 }
 0xa87   : > { %v1720_v34 = vmul.f32 %v3130_v29, %v3128_v19  ;;  %v3116_v49 = vpop.permute.xlu0 %3115 }
 0xa88   : > { %v3118_v54 = vunpack.i.h.bf16 %v3116_v49  ;;  %v3117_v51 = vunpack.i.l.bf16 %v3116_v49 }
 0xa89   : > { %2792 = vmatmul.mubr.msk.f32.vlgmr.msra.gmra.mrb[18].mxu1 %vm658_vm2, %v1720_v34 }
 0xa8a   : > { %2903 = vmatpush3.bf16.msra.mxu1 %v2902_v30  ;;  %2807 = vmatprep.mubr.msk.f32.mxu1 %vm3427_vm0, %v3428_v1  ;;  %v2917_v52 = vpack.c.bf16 %v3118_v54, %v3117_v51 }
 0xa8b   : > { %2904 = vmatprep.subr.bf16.mxu1 %v3426_v0 }
 0xa8e   : > { %2906 = vmatpush3.bf16.msra.mxu1 %v2905_v35 }
 0xa8f   : > { %2913 = vmatprep.subr.bf16.mxu1 %v3426_v0 }
 0xa91   : > { %2808 = vmatmul.mubr.msk.f32.vlgmr.msra.gmra.mrb[20].mxu1 %vm430_vm1, %v3799_v15 }
 0xa92   : > { %2829 = vmatprep.mubr.msk.f32.mxu1 %vm3427_vm0, %v3428_v1 }
 0xb5c   : > { %v1790_v43 = vpop.f32.mrb[18].mxu1 }
 0xb5d   : > { %v2793_v44 = vpop.f32.mrb[19].mxu1  ;;  %2797 = vmatmul.mubr.msk.f32.vlgmr.msra.gmra.mrb[8].mxu0 %vm658_vm2, %v1790_v43 }
 0xb5e   : > { %2909 = vmatpush3.bf16.msra.mxu0 %v2908_v40  ;;  %2818 = vmatprep.mubr.msk.f32.mxu0 %vm3427_vm0, %v3428_v1 }
 0xb5f   : > { %2910 = vmatprep.subr.bf16.mxu0 %v3426_v0 }
 0xb62   : > { %2912 = vmatpush3.bf16.msra.mxu0 %v2911_v45 }
 0xb63   : > { %2832 = vmatprep.subr.mxu0 %v3428_v1 }
 0xb64   : > { %v1947_v15 = vpop.f32.mrb[20].mxu1 }
 0xb65   : > { %2819 = vmatmul.mubr.msk.f32.vlgmr.msra.gmra.mrb[14].mxu0 %vm430_vm1, %v3795_v14  ;;  %v2809_v46 = vpop.f32.mrb[21].mxu1  ;;  %v3111_v14 = vpop.permute.xlu1 %3110 }
 0xb66   : > { %2834 = vmatprep.mubr.msk.f32.mxu0 %vm3427_vm0, %v3428_v1  ;;  %v3113_v50 = vunpack.i.h.bf16 %v3111_v14  ;;  %v3112_v53 = vunpack.i.l.bf16 %v3111_v14 }
 0xb68   : > { %v2914_v55 = vpack.c.bf16 %v3113_v50, %v3112_v53 }
 0xb6a   : > { %2915 = vmatpush3.bf16.msra.mxu1 %v2914_v55 }
 0xb6b   : > { %2916 = vmatprep.subr.bf16.mxu1 %v3426_v0 }
 0xb6e   : > { %2918 = vmatpush3.bf16.msra.mxu1 %v2917_v52 }
 0xb71   : > { %2830 = vmatmul.mubr.msk.f32.vlgmr.msra.gmra.mrb[22].mxu1 %vm430_vm1, %v3819_v26 }
 0xc38   : > { %v2029_v47 = vpop.f32.mrb[14].mxu0 }
 0xc39   : > { %v2820_v48 = vpop.f32.mrb[15].mxu0  ;;  %2833 = vmatpush3.xpose.msk.msra.mxu0 %vm658_vm2, %v2029_v47 }
 0xc3a   : > { %2837 = vmatprep.subr.mxu0 %v3428_v1 }
 0xc3c   : > { %2835 = vmatmul.mubr.msk.f32.vlgmr.msra.gmra.mrb[16].mxu0 %vm658_vm2, %v1947_v15 }
 0xc3d   : > { %2839 = vmatprep.mubr.msk.f32.mxu0 %vm3427_vm0, %v3428_v1 }
 0xc44   : > { %v2111_v0 = vpop.f32.mrb[22].mxu1 }
 0xc45   : > { %v2831_v4 = vpop.f32.mrb[23].mxu1  ;;  %2838 = vmatpush3.msra.mxu0 %v2111_v0 }
 0xc46   : > { %2842 = vmatprep.subr.mxu0 %v3428_v1 }
 0xd0f   : > { %v2187_v56 = vpop.f32.mrb[16].mxu0 }
 0xd10   : > { %v2191_v57 = vmul.f32 0.35355338, %v2187_v56  ;;  %v2836_v58 = vpop.f32.mrb[17].mxu0 }
 0xd12   : > { %v2192_v59 = vsel %vm658_vm2, %v2191_v57, -inf }
 0xd13   : > { %2193 = vmax.xlane.f32.xlu1 %v2192_v59 }
 0xda0   : > { %v2194_v61 = vpop.xlane.xlu1 %2193 }
 0xda1   : > { %v2195_v62 = vsub.f32 %v2191_v57, %v2194_v61 }
 0xda3   : > { %v2196_v63 = vmul.f32 1.442695, %v2195_v62 }
 0xda5   : > { %3131 = vpow2.f32 %v2196_v63 }
 0xdaf   : > { %v3132_v2 = vpop.eup %3131 }
 0xdb0   : > { %v2198_v3 = vsel %vm658_vm2, %v3132_v2, 0.0 }
 0xdb1   : > { %2199 = vadd.xlane.f32.xlu0 %v2198_v3 }
 0xe3e   : > { %v2200_v26 = vpop.xlane.xlu0 %2199 }
 0xe3f   : > { %3133 = vrcp.f32 %v2200_v26 }
 0xe49   : > { %v3134_v5 = vpop.eup %3133 }
 0xe4a   : > { %v2202_v6 = vmul.f32 %v3134_v5, %v3132_v2 }
 0xe4c   : > { %2840 = vmatmul.mubr.msk.f32.vlgmr.msra.gmra.mrb[18].mxu0 %vm658_vm2, %v2202_v6 }
 0xe4d   : > { %2843 = vmatpush3.msra.mxu0 %v2276_v7  ;;  %2844 = vmatprep.mubr.msk.f32.mxu0 %vm3427_vm0, %v3428_v1 }
 0xf1f   : > { %v2272_v8 = vpop.f32.mrb[18].mxu0 }
 0xf20   : > { %v2841_v9 = vpop.f32.mrb[19].mxu0  ;;  %2845 = vmatmul.mubr.msk.f32.vlgmr.msra.gmra.mrb[8].mxu0 %vm658_vm2, %v2272_v8 }
 0xff3   : > { %v2346_v10 = vpop.f32.mrb[8].mxu0 }
 0xff4   : > { %v2919_v11 = vadd.f32 %v2346_v10, %v3920_v60  ;;  %v2846_v12 = vpop.f32.mrb[9].mxu0 }
 0xff6   : > { %2351 = vst.msk [vmem:[%s422_s1] sm:$0xff] %vm430_vm1, %v2919_v11 }
 0xff7   : > { %3350 = shalt.err (!%p3347_p4)
}
 0xff8   : > { %s3351_s3 = scalar_lea.hbm %s3986_s28, 128  ;;  %s3355_s24 = scalar_lea.hbm %s4096_s12, 256 }
 0xff9   : > { %p3352_p10 = scmp.ne.s32.totalorder %s3986_s28, %s3351_s3  ;;  %p3356_p12 = scmp.lt.u32.totalorder %s3986_s28, %s4096_s12 }
 0xffa   : > { %p3357_p0 = scmp.lt.u32.totalorder %s3355_s24, %s3351_s3  ;;  %p3359_p9 = scmp.lt.u32.totalorder %s3351_s3, %s3986_s28 }
 0xffb   : > { %p3353_p3 = pnand %p3352_p10, %p4097_p13 }
 0xffc   : > { %p3358_p7 = por %p3357_p0, %p3356_p12 }
 0xffd   : > { %p3354_p8 = pneg %p3353_p3 }
 0xffe   : > { %p3360_p11 = por %p3359_p9, %p3358_p7 }
0x1000   : > { %p3361_p1 = pnand %p3360_p11, %p3354_p8 }
0x1002   : > { %3364 = shalt.err (!%p3361_p1)
}
0x1003   : > { %2946 = dma.vmem_to_hbm [thread:$0]  (%p4097_p13), %s3988_s21, 128, %s3986_s28, %s2353_s9  }
0x1004 PF: > { %s4098_s8 = sld [smem:[#allocation20_spill]]  ;;  %s4099_s19 = sld [smem:[#allocation24_spill]] }
0x1005   : > { %s4100_s16 = sld [smem:[#allocation21_spill]] }
0x100a   : > { %s2378_s14 = sand.u32 1, %s4098_s8   ;;  %p4101_p6 = scmp.ne.s32.totalorder %s4099_s19, 0 }
0x100b   : > { %p4102_p5 = scmp.ge.s32.totalorder %s4100_s16, 2  ;;  %s2379_s11 = scalar_lea.sflag [#allocation4], %s2378_s14 }
0x100d   : > { %p2972_p2 = pnand %p4102_p5, %p4101_p6 }
0x100f   : > { %3398 = dma.done.wait (!%p2972_p2), %s2379_s11, 128  }
0x1010   : > { %3400 = vsyncadd (!%p2972_p2), %s2379_s11, 4294967168  ;;  %s4103_s27 = sld [smem:[#allocation22_spill]]  ;;  %s4104_s13 = sld [smem:[#allocation23_spill]] }
0x1011   : > { %s4105_s24 = smov %s3407_s25  ;;  %s4106_s25 = smov %s3411_s26 }
0x1016   : > { %p25_p4 = scmp.ge.s32.totalorder %s4103_s27, 4   ;;  %s4107_s26 = smov %s4104_s13 }
0x1018   :  { %27 = sbr.rel (!%p25_p4) target bundleno = 14 (0xe), region = 133 }
0x101f   :  { %2384 = vsyncpa [#allocation3], 1 }
0x1020   :  { %2386 = vsyncpa [#allocation3 + $0x1], 1 }
0x1021   :  { %2387 = vsyncpa [#allocation6], 1 }
0x1022   :  { %2389 = vsyncpa [#allocation6 + $0x1], 1 }
0x1023   :  { %2390 = vsyncpa [#allocation9], 1 }
0x1024   :  { %2391 = vsyncpa [#allocation12], 1 }
0x1025   :  { %2392 = vsyncpa [#allocation4], 1 }
0x1026   :  { %2394 = vsyncpa [#allocation4 + $0x1], 1 }

</bundles_post_ra>
